<compile_context>
chip_gen: v7x
topology: tpu7x:2x2x1
jax: 0.10.0
libtpu: 0.0.40
codegen_flags: <defaults>
</compile_context>

<pallas_src>
import functools

import jax
import jax.numpy as jnp
from jax.experimental import pallas as pl
from jax.experimental.pallas import tpu as pltpu


def attention_kernel(hidden_ref, mask_ref, w_ref, b_ref, q_ref,
                     out_ref, scores_ref, *, compute_dtype):
    """One grid step processes TB batch rows.

    hidden_ref : (TB*S, H)  streamed in its original dtype (f32 or bf16)
    mask_ref   : (TB, S)    f32, 1.0 = valid token, 0.0 = padding
    w_ref      : (H, H)     matmul dtype (bf16 on the fast path)
    b_ref      : (1, H)     f32
    q_ref      : (1, H)     f32
    out_ref    : (TB, H)    f32
    scores_ref : (TB, S)    f32
    """
    TB, S = mask_ref.shape
    H = w_ref.shape[1]

    # ---- key = hidden @ W + b : one big MXU matmul, M = TB*S ---------------
    # Cast to the matmul dtype inside the kernel; the wrapper streams the
    # original tensor so there is no extra HBM read/write pass.
    lhs = hidden_ref[...].astype(w_ref.dtype)
    key = jnp.dot(lhs, w_ref[...], preferred_element_type=jnp.float32)
    key = key + b_ref[...]                                   # (TB*S, H) f32
    # Re-view as (TB, S, H) (free when S % 8 == 0, true for BERT seq lens);
    # keep it in compute_dtype (bf16 on v6e/v7x) for the two broadcast
    # multiplies; the reductions accumulate in f32.
    key3 = key.reshape(TB, S, H).astype(compute_dtype)

    # ---- logits = <key, query> : VPU multiply + lane (XLU) reduction -------
    q = q_ref[...].astype(compute_dtype)                     # (1, H)
    logits = jnp.sum(key3 * q, axis=-1, dtype=jnp.float32)   # (TB, S)

    # ---- masked softmax over the sequence axis (f32 throughout) ------------
    mask = mask_ref[...]                                     # (TB, S)
    masked_logits = jnp.where(mask == 0, jnp.float32(-1e32), logits)
    m = jnp.max(masked_logits, axis=-1, keepdims=True)       # (TB, 1)
    e = jnp.exp(masked_logits - m)
    denom = jnp.sum(e, axis=-1, keepdims=True)               # (TB, 1)
    inv = 1.0 / denom              # exact divide on (TB,1): negligible cost,
    scores = e * inv               # user-visible scores rows sum to 1
    masked_scores = scores * mask  # mask is {0,1}: one VPU mul, no select

    # ---- output = scores-weighted sum of key over S (sublane reduce) -------
    w_s = masked_scores.astype(compute_dtype)[:, :, None]    # (TB, S, 1)
    out = jnp.sum(key3 * w_s, axis=1, dtype=jnp.float32)     # (TB, H)

    out_ref[...] = out.astype(out_ref.dtype)
    scores_ref[...] = scores.astype(scores_ref.dtype)


def _vmem_budget_bytes():
    """Generation-aware VMEM budget: ~48 MiB on v7x (64 MiB physical per TC),
    ~96 MiB on v5e/v6e (128 MiB physical). Conservative fallback = v7x."""
    try:
        cap = int(pltpu.get_tpu_info().vmem_capacity_bytes)
    except Exception:
        cap = 64 << 20
    return int(min((cap * 3) // 4, 100 << 20))


def _supports_bf16_elementwise():
    """bf16 VALU exists on v6e / v7x; v2-v5 keep f32 elementwise."""
    try:
        kind = jax.devices()[0].device_kind.lower()
    except Exception:
        return True
    return not any(tag in kind for tag in ("v2", "v3", "v4", "v5"))


def _choose_batch_tile(batch, seq, hidden, in_isize, mm_isize, cmp_isize,
                       budget_bytes):
    """Per-grid-step batch tile TB (multiple of 8, or == batch when batch<=8)."""
    if batch <= 8:
        # Tiny batch: one grid step; every block equals the full array dims,
        # so no (8,128) block-shape constraint and no padding is needed.
        return batch
    # Constant tiles (weight / bias / query), double-buffered by the pipeline.
    const_bytes = 2 * hidden * hidden * mm_isize + 4 * hidden * 4 * 2
    # Per-batch-row working set of one grid step, including the in-kernel cast
    # of the lhs, the key intermediate and ~2x broadcast-product temporaries.
    per_row = (2 * seq * hidden * in_isize        # streamed hidden tile (x2 buf)
               + seq * hidden * mm_isize          # lhs cast to matmul dtype
               + 3 * seq * hidden * cmp_isize     # key + product temporaries
               + 2 * seq * 4                      # mask tile (x2 buf)
               + 2 * hidden * 4 + 2 * seq * 4     # out / scores tiles (x2 buf)
               + 8 * seq * 4)                     # softmax temporaries
    tb = (budget_bytes - const_bytes) // max(per_row, 1)
    # Keep TB*S in the ~1-4K row range: large enough to amortize the ~0.35us
    # per-step overhead, small enough to stay pipeline/VMEM friendly.
    tb = min(tb, max(8, 4096 // max(seq, 1)))
    # At least two grid steps so the "parallel" axis can shard work across
    # both v7x TensorCores.
    half = -(-batch // 2)
    half = ((half + 7) // 8) * 8
    tb = min(tb, half)
    return max(8, (tb // 8) * 8)


def attention_forward(batch_hidden, batch_masks, weight, bias, query,
                      *, matmul_dtype=jnp.bfloat16):
    """Pallas forward of bert_rnn.Attention. Returns (batch_outputs, attn_scores)."""
    B, S, H = batch_hidden.shape

    mm_dtype = jnp.dtype(matmul_dtype)
    use_bf16_ew = (mm_dtype == jnp.dtype(jnp.bfloat16)
                   and _supports_bf16_elementwise())
    compute_dtype = jnp.bfloat16 if use_bf16_ew else jnp.float32

    in_isize = jnp.dtype(batch_hidden.dtype).itemsize
    mm_isize = mm_dtype.itemsize
    cmp_isize = jnp.dtype(compute_dtype).itemsize

    budget = _vmem_budget_bytes()
    TB = _choose_batch_tile(B, S, H, in_isize, mm_isize, cmp_isize, budget)
    n_steps = -(-B // TB)
    B_pad = n_steps * TB

    # Only the tiny (B, S) mask is padded; padded rows are fully masked so they
    # produce finite uniform scores and zero output, and their output rows fall
    # outside the (B, ...) output arrays so Pallas drops the writes.  The big
    # (B, S, H) hidden tensor is streamed as-is (ragged last block).
    masks = batch_masks.astype(jnp.float32)
    if B_pad != B:
        masks = jnp.pad(masks, ((0, B_pad - B), (0, 0)))

    hidden2 = batch_hidden.reshape(B * S, H)      # metadata-only, no cast/copy
    w_mm = weight.astype(matmul_dtype)            # tiny (H,H): ok in wrapper
    bias2 = bias.reshape(1, H).astype(jnp.float32)
    query2 = query.reshape(1, H).astype(jnp.float32)

    kernel = functools.partial(attention_kernel, compute_dtype=compute_dtype)

    out, scores = pl.pallas_call(
        kernel,
        out_shape=(
            jax.ShapeDtypeStruct((B, H), jnp.float32),   # batch_outputs
            jax.ShapeDtypeStruct((B, S), jnp.float32),   # attn_scores
        ),
        grid=(n_steps,),
        in_specs=[
            pl.BlockSpec((TB * S, H), lambda b: (b, 0)),   # hidden rows
            pl.BlockSpec((TB, S), lambda b: (b, 0)),        # masks
            pl.BlockSpec((H, H), lambda b: (0, 0)),         # weight (resident)
            pl.BlockSpec((1, H), lambda b: (0, 0)),         # bias
            pl.BlockSpec((1, H), lambda b: (0, 0)),         # query
        ],
        out_specs=(
            pl.BlockSpec((TB, H), lambda b: (b, 0)),
            pl.BlockSpec((TB, S), lambda b: (b, 0)),
        ),
        compiler_params=pltpu.CompilerParams(
            dimension_semantics=("parallel",),
            vmem_limit_bytes=budget),
    )(hidden2, masks, w_mm, bias2, query2)

    return out, scores


def attention_reference(batch_hidden, batch_masks, weight, bias, query):
    """Pure-JAX f32 reference matching the PyTorch module."""
    hp = jax.lax.Precision.HIGHEST
    key = jnp.einsum("bsh,hk->bsk", batch_hidden, weight, precision=hp) + bias
    logits = jnp.einsum("bsh,h->bs", key, query, precision=hp)
    masked = jnp.where(batch_masks == 0, jnp.float32(-1e32), logits)
    scores = jax.nn.softmax(masked, axis=1)
    masked_scores = jnp.where(batch_masks == 0, 0.0, scores)
    out = jnp.einsum("bs,bsh->bh", masked_scores, key, precision=hp)
    return out, scores


if __name__ == "__main__":
    B, S, H = 2, 8, 32

    key0 = jax.random.PRNGKey(0)
    k_hidden, k_weight, k_query = jax.random.split(key0, 3)

    batch_hidden = jax.random.normal(k_hidden, (B, S, H), dtype=jnp.float32)
    # masks: first example fully valid, second example has trailing padding
    batch_masks = jnp.array(
        [[1.0] * S,
         [1.0] * (S - 3) + [0.0] * 3],
        dtype=jnp.float32)

    # Parameter init matching the module's __init__:
    #   weight ~ N(0, 0.05), bias = 0, query ~ N(0, 0.05)
    weight = 0.05 * jax.random.normal(k_weight, (H, H), dtype=jnp.float32)
    bias = jnp.zeros((H,), dtype=jnp.float32)
    query = 0.05 * jax.random.normal(k_query, (H,), dtype=jnp.float32)

    ref_out, ref_scores = attention_reference(
        batch_hidden, batch_masks, weight, bias, query)

    # ---- fast path: bf16 matmul / elementwise, f32 softmax -----------------
    out_bf16, sc_bf16 = attention_forward(
        batch_hidden, batch_masks, weight, bias, query,
        matmul_dtype=jnp.bfloat16)
    jax.block_until_ready((out_bf16, sc_bf16))
    assert out_bf16.shape == (B, H)
    assert sc_bf16.shape == (B, S)
    assert jnp.allclose(out_bf16, ref_out, atol=2e-2, rtol=2e-2)
    assert jnp.allclose(sc_bf16, ref_scores, atol=2e-2, rtol=2e-2)

    # ---- exact path: f32 matmul + f32 elementwise (tight validation) -------
    out_f32, sc_f32 = attention_forward(
        batch_hidden, batch_masks, weight, bias, query,
        matmul_dtype=jnp.float32)
    jax.block_until_ready((out_f32, sc_f32))
    assert jnp.allclose(out_f32, ref_out, atol=1e-4, rtol=1e-4)
    assert jnp.allclose(sc_f32, ref_scores, atol=1e-4, rtol=1e-4)

    # ---- larger batch: exercises batch tiling + ragged-last-tile path ------
    B2 = 20
    k_h2, k_len = jax.random.split(jax.random.PRNGKey(1))
    hidden_big = jax.random.normal(k_h2, (B2, S, H), dtype=jnp.float32)
    lengths = jax.random.randint(k_len, (B2,), 1, S + 1)
    masks_big = (jnp.arange(S)[None, :] < lengths[:, None]).astype(jnp.float32)
    out_big, sc_big = attention_forward(
        hidden_big, masks_big, weight, bias, query)   # default bf16 path
    jax.block_until_ready((out_big, sc_big))
    ref_out_big, ref_sc_big = attention_reference(
        hidden_big, masks_big, weight, bias, query)
    assert out_big.shape == (B2, H)
    assert sc_big.shape == (B2, S)
    assert jnp.allclose(out_big, ref_out_big, atol=2e-2, rtol=2e-2)
    assert jnp.allclose(sc_big, ref_sc_big, atol=2e-2, rtol=2e-2)

    print("KERNEL_OK")
</pallas_src>

<mosaic_0001>
module attributes {stable_mosaic.version = 11 : i64} {
  func.func @attention_kernel(%arg0: i32, %arg1: memref<16x32xf32, #tpu.memory_space<vmem>>, %arg2: memref<2x8xf32, #tpu.memory_space<vmem>>, %arg3: memref<32x32xbf16, #tpu.memory_space<vmem>>, %arg4: memref<1x32xf32, #tpu.memory_space<vmem>>, %arg5: memref<1x32xf32, #tpu.memory_space<vmem>>, %arg6: memref<2x32xf32, #tpu.memory_space<vmem>>, %arg7: memref<2x8xf32, #tpu.memory_space<vmem>>) attributes {dimension_semantics = [#tpu.dimension_semantics<parallel>], iteration_bounds = array<i64: 1>, scalar_prefetch = 0 : i64, scratch_operands = 0 : i64, tpu.core_type = #tpu.core_type<tc>, window_params = [{transform_indices = @transform_0, window_bounds = array<i64: 16, 32>}, {transform_indices = @transform_1, window_bounds = array<i64: 2, 8>}, {pipeline_mode = #tpu.pipeline_mode<synchronous>, transform_indices = @transform_2, window_bounds = array<i64: 32, 32>}, {pipeline_mode = #tpu.pipeline_mode<synchronous>, transform_indices = @transform_3, window_bounds = array<i64: 1, 32>}, {pipeline_mode = #tpu.pipeline_mode<synchronous>, transform_indices = @transform_4, window_bounds = array<i64: 1, 32>}, {transform_indices = @transform_5, window_bounds = array<i64: 2, 32>}, {transform_indices = @transform_6, window_bounds = array<i64: 2, 8>}]} {
    %c0 = arith.constant 0 : index
    %c0_0 = arith.constant 0 : index
    %0 = vector.load %arg1[%c0, %c0_0] : memref<16x32xf32, #tpu.memory_space<vmem>>, vector<16x32xf32>
    %1 = arith.truncf %0 : vector<16x32xf32> to vector<16x32xbf16>
    %c0_1 = arith.constant 0 : index
    %c0_2 = arith.constant 0 : index
    %2 = vector.load %arg3[%c0_1, %c0_2] : memref<32x32xbf16, #tpu.memory_space<vmem>>, vector<32x32xbf16>
    %cst = arith.constant dense<0.000000e+00> : vector<16x32xf32>
    %3 = tpu.matmul %1, %2, %cst {dimension_numbers = #tpu.dot_dimension_numbers<[1], [0], [0], [1], [0, 0, 1, 1], [], []>} : vector<16x32xbf16>, vector<32x32xbf16>, vector<16x32xf32> -> vector<16x32xf32>
    %c0_3 = arith.constant 0 : index
    %c0_4 = arith.constant 0 : index
    %4 = vector.load %arg4[%c0_3, %c0_4] : memref<1x32xf32, #tpu.memory_space<vmem>>, vector<1x32xf32>
    %5 = vector.broadcast %4 : vector<1x32xf32> to vector<16x32xf32>
    %6 = arith.addf %3, %5 : vector<16x32xf32>
    %7 = vector.shape_cast %6 : vector<16x32xf32> to vector<2x8x32xf32>
    %8 = arith.truncf %7 : vector<2x8x32xf32> to vector<2x8x32xbf16>
    %c0_5 = arith.constant 0 : index
    %c0_6 = arith.constant 0 : index
    %9 = vector.load %arg5[%c0_5, %c0_6] : memref<1x32xf32, #tpu.memory_space<vmem>>, vector<1x32xf32>
    %10 = arith.truncf %9 : vector<1x32xf32> to vector<1x32xbf16>
    %11 = vector.shape_cast %10 : vector<1x32xbf16> to vector<1x1x32xbf16>
    %12 = vector.broadcast %11 : vector<1x1x32xbf16> to vector<2x8x32xbf16>
    %13 = arith.mulf %8, %12 : vector<2x8x32xbf16>
    %14 = arith.extf %13 : vector<2x8x32xbf16> to vector<2x8x32xf32>
    %cst_7 = arith.constant dense<0.000000e+00> : vector<2x8xf32>
    %15 = vector.multi_reduction <add>, %14, %cst_7 [2] : vector<2x8x32xf32> to vector<2x8xf32>
    %c0_8 = arith.constant 0 : index
    %c0_9 = arith.constant 0 : index
    %16 = vector.load %arg2[%c0_8, %c0_9] : memref<2x8xf32, #tpu.memory_space<vmem>>, vector<2x8xf32>
    %cst_10 = arith.constant 0.000000e+00 : f32
    %17 = vector.broadcast %cst_10 : f32 to vector<2x8xf32>
    %18 = arith.cmpf oeq, %16, %17 : vector<2x8xf32>
    %cst_11 = arith.constant -1.000000e+32 : f32
    %19 = vector.broadcast %cst_11 : f32 to vector<2x8xf32>
    %20 = arith.select %18, %19, %15 : vector<2x8xi1>, vector<2x8xf32>
    %cst_12 = arith.constant dense<0xFF800000> : vector<2xf32>
    %21 = vector.multi_reduction <maximumf>, %20, %cst_12 [1] : vector<2x8xf32> to vector<2xf32>
    %22 = vector.shape_cast %21 : vector<2xf32> to vector<2x1xf32>
    %23 = vector.broadcast %22 : vector<2x1xf32> to vector<2x8xf32>
    %24 = arith.subf %20, %23 : vector<2x8xf32>
    %25 = math.exp %24 : vector<2x8xf32>
    %cst_13 = arith.constant dense<0.000000e+00> : vector<2xf32>
    %26 = vector.multi_reduction <add>, %25, %cst_13 [1] : vector<2x8xf32> to vector<2xf32>
    %27 = vector.shape_cast %26 : vector<2xf32> to vector<2x1xf32>
    %cst_14 = arith.constant 1.000000e+00 : f32
    %28 = vector.broadcast %cst_14 : f32 to vector<2x1xf32>
    %29 = arith.divf %28, %27 : vector<2x1xf32>
    %30 = vector.broadcast %29 : vector<2x1xf32> to vector<2x8xf32>
    %31 = arith.mulf %25, %30 : vector<2x8xf32>
    %32 = arith.mulf %31, %16 : vector<2x8xf32>
    %33 = arith.truncf %32 : vector<2x8xf32> to vector<2x8xbf16>
    %34 = vector.shape_cast %33 : vector<2x8xbf16> to vector<2x8x1xbf16>
    %35 = vector.broadcast %34 : vector<2x8x1xbf16> to vector<2x8x32xbf16>
    %36 = arith.mulf %8, %35 : vector<2x8x32xbf16>
    %37 = arith.extf %36 : vector<2x8x32xbf16> to vector<2x8x32xf32>
    %cst_15 = arith.constant dense<0.000000e+00> : vector<2x32xf32>
    %38 = vector.multi_reduction <add>, %37, %cst_15 [1] : vector<2x8x32xf32> to vector<2x32xf32>
    %c0_16 = arith.constant 0 : index
    %c0_17 = arith.constant 0 : index
    %39 = vector.load %arg6[%c0_16, %c0_17] : memref<2x32xf32, #tpu.memory_space<vmem>>, vector<2x32xf32>
    tpu.vector_store %arg6[%c0_16, %c0_17], %38 {strides = array<i32>} : memref<2x32xf32, #tpu.memory_space<vmem>>, vector<2x32xf32>,
    %c0_18 = arith.constant 0 : index
    %c0_19 = arith.constant 0 : index
    %40 = vector.load %arg7[%c0_18, %c0_19] : memref<2x8xf32, #tpu.memory_space<vmem>>, vector<2x8xf32>
    tpu.vector_store %arg7[%c0_18, %c0_19], %31 {strides = array<i32>} : memref<2x8xf32, #tpu.memory_space<vmem>>, vector<2x8xf32>,
    return
  }
  func.func @transform_0(%arg0: i32) -> (i32, i32) {
    %c0_i32 = arith.constant 0 : i32
    %c0_i32_0 = arith.constant 0 : i32
    return %arg0, %c0_i32 : i32, i32
  }
  func.func @transform_1(%arg0: i32) -> (i32, i32) {
    %c0_i32 = arith.constant 0 : i32
    %c0_i32_0 = arith.constant 0 : i32
    return %arg0, %c0_i32 : i32, i32
  }
  func.func @transform_2(%arg0: i32) -> (i32, i32) {
    %c0_i32 = arith.constant 0 : i32
    %c0_i32_0 = arith.constant 0 : i32
    %c0_i32_1 = arith.constant 0 : i32
    return %c0_i32, %c0_i32_0 : i32, i32
  }
  func.func @transform_3(%arg0: i32) -> (i32, i32) {
    %c0_i32 = arith.constant 0 : i32
    %c0_i32_0 = arith.constant 0 : i32
    %c0_i32_1 = arith.constant 0 : i32
    return %c0_i32, %c0_i32_0 : i32, i32
  }
  func.func @transform_4(%arg0: i32) -> (i32, i32) {
    %c0_i32 = arith.constant 0 : i32
    %c0_i32_0 = arith.constant 0 : i32
    %c0_i32_1 = arith.constant 0 : i32
    return %c0_i32, %c0_i32_0 : i32, i32
  }
  func.func @transform_5(%arg0: i32) -> (i32, i32) {
    %c0_i32 = arith.constant 0 : i32
    %c0_i32_0 = arith.constant 0 : i32
    return %arg0, %c0_i32 : i32, i32
  }
  func.func @transform_6(%arg0: i32) -> (i32, i32) {
    %c0_i32 = arith.constant 0 : i32
    %c0_i32_0 = arith.constant 0 : i32
    return %arg0, %c0_i32 : i32, i32
  }
}

</mosaic_0001>

<bundles_post_ra>
// kernel: tpu_custom_call.1
= control target key start
LH: loop header
LB: loop body
LE: loop exit
PB: predicated region body
PF: predicated region fallthrough
CT: control target
= control target key end

     0   :  { %12 = vsyncpa [#allocation3], 0  ;;  %s500_s0 = inlined_call_operand.hbm [shape: f32[16,32], index: 0, kind: input, shape index: {}]   ;;  %s501_s1 = inlined_call_operand.vmem [shape: f32[2,8], index: 1, kind: input, shape index: {}]   ;;  %s502_s2 = inlined_call_operand.hbm [shape: bf16[32,32], index: 2, kind: input, shape index: {}]   ;;  %s503_s3 = inlined_call_operand.vmem [shape: f32[1,32], index: 3, kind: input, shape index: {}]   ;;  %s504_s4 = inlined_call_operand.vmem [shape: f32[1,32], index: 4, kind: input, shape index: {}]   ;;  %s505_s5 = inlined_call_operand.hbm [shape: f32[2,32], index: 5, kind: output, shape index: {0}]   ;;  %s506_s6 = inlined_call_operand.hbm [shape: f32[2,8], index: 6, kind: output, shape index: {1}]  }
   0x1   :  { %13 = vsyncpa [#allocation6], 0 }
   0x2   :  { %14 = vsyncpa [#allocation4], 0 }
   0x3   :  { %15 = vsyncpa [#allocation9], 0  ;;  %s380_s21 = smov [#allocation2]   ;;  %s284_s25 = scalar_lea.hbm %s500_s0, 256 }
   0x4   :  { %s21_s22 = sshll.u32 %s380_s21, 4  ;;  %p285_p0 = scmp.ne.s32.totalorder %s500_s0, %s284_s25  ;;  %s22_s22 = int_to_ptr.vmem [resolvable:$true] %s21_s22 }
   0x5   :  { %p288_p1 = scmp.lt.u32.totalorder %s284_s25, %s500_s0 }
   0x7   :  { %p290_p2 = pnand %p288_p1, %p285_p0 }
   0x9   :  { %293 = shalt.err (!%p290_p2)
}
   0xa   :  { %s294_s30 = scalar_lea.vmem %s22_s22, 256  ;;  %p299_p4 = scmp.lt.s32.totalorder %s22_s22, %s22_s22 }
   0xb   :  { %p295_p3 = scmp.ne.s32.totalorder %s22_s22, %s294_s30  ;;  %p300_p5 = scmp.lt.s32.totalorder %s294_s30, %s294_s30 }
   0xd   :  { %p301_p6 = por %p300_p5, %p299_p4 }
   0xf   :  { %p302_p7 = pnand %p301_p6, %p295_p3 }
  0x11   :  { %305 = shalt.err (!%p302_p7)
}
  0x12   :  { %s381_s7 = smov 128   ;;  %s382_s8 = smov 8  }
  0x13   :  { %27 = dma.hbm_to_vmem [thread:$0]  %s500_s0, 256, %s22_s22, [#allocation3], %s381_s7, %s381_s7, %s382_s8  }
  0x14   :  { %s383_s11 = smov [#allocation5]   ;;  %s306_s15 = scalar_lea.hbm %s502_s2, 256 }
  0x15   :  { %s35_s12 = sshll.u32 %s383_s11, 4  ;;  %p307_p8 = scmp.ne.s32.totalorder %s502_s2, %s306_s15  ;;  %s36_s12 = int_to_ptr.vmem [resolvable:$true] %s35_s12 }
  0x16   :  { %p310_p9 = scmp.lt.u32.totalorder %s306_s15, %s502_s2 }
  0x18   :  { %p312_p10 = pnand %p310_p9, %p307_p8 }
  0x1a   :  { %315 = shalt.err (!%p312_p10)
}
  0x1b   :  { %s316_s20 = scalar_lea.vmem %s36_s12, 256  ;;  %p321_p12 = scmp.lt.s32.totalorder %s36_s12, %s36_s12 }
  0x1c   :  { %p317_p11 = scmp.ne.s32.totalorder %s36_s12, %s316_s20  ;;  %p322_p13 = scmp.lt.s32.totalorder %s316_s20, %s316_s20 }
  0x1e   :  { %p323_p0 = por %p322_p13, %p321_p12 }
  0x20   :  { %p324_p1 = pnand %p323_p0, %p317_p11 }
  0x22   :  { %327 = shalt.err (!%p324_p1)
}
  0x23   :  { %s384_s0 = smov 64   ;;  %s385_s21 = smov 4  }
  0x24   :  { %41 = dma.hbm_to_vmem [thread:$0]  %s502_s2, 256, %s36_s12, [#allocation6], %s384_s0, %s384_s0, %s385_s21  }
  0x25   :  { %372 = dma.done.wait [#allocation3], 256  }
  0x26   :  { %373 = vsyncadd [#allocation3], 4294967040 }
  0x27   :  { %374 = dma.done.wait [#allocation6], 256  }
  0x28   :  { %375 = vsyncadd [#allocation6], 4294967040  ;;  %v386_v0 = vmov 0.0   ;;  %vm387_vm0 = vmmov 0   ;;  %v278_v1 = vld [vmem:[#allocation5] sm:$0xff]   ;;  %v279_v2 = vld [vmem:[#allocation5 + $0x8] sm:$0xff]   ;;  %v131_v6 = vlaneseq }
  0x29   :  { %260 = vmatprep.subr.bf16.mxu0 %v386_v0  ;;  %264 = vmatprep.mubr.msk.bf16.mxu0 %vm387_vm0, %v386_v0  ;;  %v53_v3 = vld [vmem:[#allocation2] sm:$0xff]  ;;  %v54_v4 = vld [vmem:[#allocation2 + $0x8] sm:$0xff]  ;;  %vm79_vm1 = vcmask 261120   ;;  %vm159_vm2 = vcmask 1041409   ;;  %vm163_vm4 = vcmask 58368  }
  0x2a   :  { %261 = vmatpush3.bf16.msra.mxu0 %v278_v1  ;;  %v55_v5 = vpack.c.bf16 %v54_v4, %v53_v3  ;;  %v132_v7 = vshrl.u32 %v131_v6, 7  ;;  %v150_v8 = vand.u32 127, %v131_v6  ;;  %v126_v10 = vld [vmem:[%s504_s4] sm:$0x1] }
  0x2b   :  { %262 = vmatprep.subr.bf16.mxu0 %v386_v0  ;;  %v127_v11 = vpack.c.bf16 %v126_v10, %v126_v10  ;;  %v253_v14 = vld [vmem:[%s503_s3] ss:$0 sm:$0xff] }
  0x2c   :  { %v153_v9 = vsub.s32 %v150_v8, %v132_v7  ;;  %v133_v13 = vsub.s32 0, %v132_v7  ;;  %v145_v31 = vld [vmem:[%s501_s1] sm:$0x3]  ;;  %s388_s1 = smov [#allocation8]  }
  0x2d   :  { %v129_v12 = vpack.i.b16 %v127_v11, %v127_v11  ;;  %vm146_vm3 = vcmp.eq.f32.partialorder %v145_v31, 0.0  ;;  %s239_s27 = sshll.u32 %s388_s1, 4  ;;  %s240_s27 = int_to_ptr.vmem [resolvable:$true] %s239_s27 }
  0x2e   :  { %263 = vmatpush3.bf16.msra.mxu0 %v279_v2  ;;  %s328_s28 = scalar_lea.vmem %s240_s27, 32  ;;  %p333_p3 = scmp.lt.s32.totalorder %s240_s27, %s240_s27 }
  0x2f   :  { %v134_v18 = vrot.slane %v129_v12, %v133_v13  ;;  %p329_p2 = scmp.ne.s32.totalorder %s240_s27, %s328_s28  ;;  %p334_p4 = scmp.lt.s32.totalorder %s328_s28, %s328_s28 }
  0x31   :  { %265 = vmatmul.mubr.msk.bf16.vlgmr.msra.gmra.mrb[0].mxu0 %vm79_vm1, %v55_v5  ;;  %p335_p5 = por %p334_p4, %p333_p3 }
  0x33   :  { %p336_p6 = pnand %p335_p5, %p329_p2 }
 0x104   :  { %v117_v15 = vpop.f32.mrb[0].mxu0 }
 0x105   :  { %v118_v16 = vadd.f32 %v253_v14, %v117_v15  ;;  %v266_v17 = vpop.f32.mrb[1].mxu0 }
 0x106   :  { %v120_v19 = vpop.f32.mrb[2].mxu0 }
 0x107   :  { %v456_v20 = vpack.c.bf16 %v118_v16, %v118_v16  ;;  %v121_v21 = vadd.f32 %v253_v14, %v120_v19  ;;  %v267_v22 = vpop.f32.mrb[3].mxu0 }
 0x109   :  { %v458_v23 = vpack.c.bf16 %v121_v21, %v121_v21  ;;  %v135_v24 = vmul.bf16 %v134_v18, %v456_v20 }
 0x10b   :  { %v137_v25 = vunpack.c.l.bf16 %v135_v24  ;;  %v136_v26 = vmul.bf16 %v134_v18, %v458_v23 }
 0x10d   :  { %v139_v27 = vsel %vm79_vm1, %v137_v25, 0.0  ;;  %v138_v28 = vunpack.c.l.bf16 %v136_v26 }
 0x10e   :  { %140 = vadd.xlane.f32.xlu0 %v139_v27 }
 0x10f   :  { %v142_v29 = vsel %vm79_vm1, %v138_v28, 0.0 }
 0x112   :  { %143 = vadd.xlane.f32.xlu0 %v142_v29 }
 0x19b   :  { %v141_v30 = vpop.xlane.xlu0 %140 }
 0x19c   :  { %v154_v33 = vrot.slane %v141_v30, %v153_v9 }
 0x19f   :  { %v144_v32 = vpop.xlane.xlu0 %143 }
 0x1a0   :  { %v158_v34 = vrot.slane %v144_v32, %v153_v9 }
 0x1a2   :  { %v160_v35 = vsel %vm159_vm2, %v158_v34, %v154_v33 }
 0x1a3   :  { %v162_v36 = vsel %vm146_vm3, -1e+32, %v160_v35 }
 0x1a4   :  { %v164_v37 = vsel %vm163_vm4, %v162_v36, -inf }
 0x1a5   :  { %165 = vmax.xlane.f32.xlu1 %v164_v37 }
 0x232   :  { %v166_v38 = vpop.xlane.xlu1 %165 }
 0x233   :  { %v167_v39 = vsub.f32 %v162_v36, %v166_v38 }
 0x235   :  { %v168_v40 = vmul.f32 1.442695, %v167_v39 }
 0x237   :  { %280 = vpow2.f32 %v168_v40 }
 0x241   :  { %v281_v41 = vpop.eup %280 }
 0x242   :  { %v170_v42 = vsel %vm163_vm4, %v281_v41, 0.0 }
 0x243   :  { %171 = vadd.xlane.f32.xlu1 %v170_v42 }
 0x2d0   :  { %v172_v43 = vpop.xlane.xlu1 %171 }
 0x2d1   :  { %282 = vrcp.f32 %v172_v43 }
 0x2db   :  { %v283_v44 = vpop.eup %282 }
 0x2dc   :  { %v175_v45 = vmul.f32 %v283_v44, %v281_v41 }
 0x2de   :  { %v176_v46 = vmul.f32 %v175_v45, %v145_v31  ;;  %222 = vst.msk [vmem:[#allocation8] sm:$0x3] %vm163_vm4, %v175_v45 }
 0x2e0   :  { %v177_v47 = vpack.c.bf16 %v176_v46, %v176_v46 }
 0x2e2   :  { %v179_v48 = vpack.i.b16 %v177_v47, %v177_v47  ;;  %v188_v49 = vshrl.u32 %v177_v47, 16 }
 0x2e4   :  { %v184_v50 = vrot.slane %v179_v48, %v133_v13  ;;  %v189_v51 = vpack.i.b16 %v188_v49, %v188_v49 }
 0x2e6   :  { %186 = vbcast.lane.c.b16.xlu0 %v184_v50, 256  ;;  %v194_v52 = vrot.slane %v189_v51, %v133_v13 }
 0x2e8   :  { %196 = vbcast.lane.c.b16.xlu1 %v194_v52, 256 }
 0x2e9   :  { %339 = shalt.err (!%p336_p6)
}
 0x2ea   :  { %s340_s7 = scalar_lea.hbm %s506_s6, 32 }
 0x2eb   :  { %p341_p7 = scmp.ne.s32.totalorder %s506_s6, %s340_s7  ;;  %p344_p8 = scmp.lt.u32.totalorder %s340_s7, %s506_s6 }
 0x2ed   :  { %p346_p9 = pnand %p344_p8, %p341_p7 }
 0x2ef   :  { %349 = shalt.err (!%p346_p9)
}
 0x2f0   :  { %242 = dma.vmem_to_hbm [thread:$0]  %s240_s27, 32, %s506_s6, [#allocation9]   ;;  %vm220_vm5 = vcmask 254976  }
 0x2f1   :  { %s389_s6 = smov [#allocation7]  }
 0x2f2   :  { %s229_s14 = sshll.u32 %s389_s6, 4  ;;  %s230_s14 = int_to_ptr.vmem [resolvable:$true] %s229_s14 }
 0x2f3   :  { %s350_s15 = scalar_lea.vmem %s230_s14, 32  ;;  %p355_p11 = scmp.lt.s32.totalorder %s230_s14, %s230_s14 }
 0x2f4   :  { %p351_p10 = scmp.ne.s32.totalorder %s230_s14, %s350_s15  ;;  %p356_p12 = scmp.lt.s32.totalorder %s350_s15, %s350_s15 }
 0x2f6   :  { %p357_p13 = por %p356_p12, %p355_p11 }
 0x2f8   :  { %p358_p0 = pnand %p357_p13, %p351_p10 }
 0x358   :  { %v187_v53 = vpop.permute.xlu0 %186 }
 0x359   :  { %v198_v54 = vmul.bf16 %v187_v53, %v456_v20 }
 0x35a   :  { %v197_v55 = vpop.permute.xlu1 %196 }
 0x35b   :  { %v200_v56 = vunpack.c.l.bf16 %v198_v54  ;;  %v199_v57 = vmul.bf16 %v197_v55, %v458_v23 }
 0x35d   :  { %v202_v58 = vsel %vm79_vm1, %v200_v56, 0.0  ;;  %v201_v59 = vunpack.c.l.bf16 %v199_v57 }
 0x35e   :  { %v203_v60 = vrot.slane %v202_v58, 4 }
 0x35f   :  { %v209_v61 = vsel %vm79_vm1, %v201_v59, 0.0 }
 0x360   :  { %v204_v62 = vadd.f32 %v203_v60, %v202_v58  ;;  %v210_v63 = vrot.slane %v209_v61, 4 }
 0x362   :  { %v205_v0 = vrot.slane %v204_v62, 2  ;;  %v211_v1 = vadd.f32 %v210_v63, %v209_v61 }
 0x364   :  { %v206_v2 = vadd.f32 %v205_v0, %v204_v62  ;;  %v212_v3 = vrot.slane %v211_v1, 2 }
 0x366   :  { %v207_v4 = vrot.slane %v206_v2, 1  ;;  %v213_v5 = vadd.f32 %v212_v3, %v211_v1 }
 0x368   :  { %v214_v6 = vrot.slane %v213_v5, 1  ;;  %v208_v7 = vadd.f32 %v207_v4, %v206_v2 }
 0x36a   :  { %v215_v8 = vadd.f32 %v214_v6, %v213_v5 }
 0x36c   :  { %v218_v9 = vsel %vm159_vm2, %v215_v8, %v208_v7 }
 0x36d   :  { %221 = vst.msk [vmem:[#allocation7] sm:$0x3] %vm220_vm5, %v218_v9 }
 0x36e   :  { %361 = shalt.err (!%p358_p0)
}
 0x36f   :  { %s362_s18 = scalar_lea.hbm %s505_s5, 32 }
 0x370   :  { %p363_p1 = scmp.ne.s32.totalorder %s505_s5, %s362_s18  ;;  %p366_p2 = scmp.lt.u32.totalorder %s362_s18, %s505_s5 }
 0x372   :  { %p368_p3 = pnand %p366_p2, %p363_p1 }
 0x374   :  { %371 = shalt.err (!%p368_p3)
}
 0x375   :  { %232 = dma.vmem_to_hbm [thread:$0]  %s230_s14, 32, %s505_s5, [#allocation4]  }
 0x376   :  { %376 = dma.done.wait [#allocation4], 32  }
 0x377   :  { %377 = vsyncadd [#allocation4], 4294967264 }
 0x378   :  { %378 = dma.done.wait [#allocation9], 32  }
 0x379   :  { %379 = vsyncadd [#allocation9], 4294967264 }
 0x37a   :  { %249 = vsyncpa [#allocation3], 1 }
 0x37b   :  { %250 = vsyncpa [#allocation6], 1 }
 0x37c   :  { %251 = vsyncpa [#allocation4], 1 }
 0x37d   :  { %252 = vsyncpa [#allocation9], 1 }

</bundles_post_ra>
